<compile_context>
chip_gen: v5e
topology: v5e:2x2
jax: 0.10.0
libtpu: 0.0.40
codegen_flags: <defaults>
</compile_context>

<pallas_src>
import numpy as np
import jax
import jax.numpy as jnp
from jax.experimental import pallas as pl
from jax.experimental.pallas import tpu as pltpu

EPS = 1e-5
_VMEM = pl.BlockSpec(memory_space=pltpu.MemorySpace.VMEM)


# ------------------------------ Pallas kernel -------------------------------

def graph_layer_kernel(x_ref, w1_ref, w2d_ref, gamma_ref, beta_ref,
                       hidden_ref, y_ref):
    """Fused GraphLayer forward.

    x:      (B, Din)
    w1:     (Din, Dout*H)  masked-dense SparseLinear #1 weights, pre-transposed
    w2d:    (1, Dout*H)    flattened block-diagonal SparseLinear #2 weights:
                           w2d[0, o*H+h] multiplies hidden unit (o, h) into y[:, o]
    gamma:  (1, Dout*H)    BatchNorm affine weight (default init = 1)
    beta:   (1, Dout*H)    BatchNorm affine bias   (default init = 0)
    hidden: (B, Dout*H)    OUT: post-batchnorm activations (flat)
    y:      (B, Dout)      OUT: final activations
    """
    dh = w1_ref.shape[1]
    d_out = y_ref.shape[1]
    h = dh // d_out

    # dropout1 (p = 0) is the identity.
    # TODO(synk): non-zero dropout would need pltpu.prng_seed/prng_random_bits.

    # linear1 (sparse == masked dense) -> tanh.  MXU with f32 accumulation.
    # TODO(synk): at real ontology sizes cast the x / w1 tiles to bf16 (keep
    # preferred_element_type=f32) for ~3x MXU throughput and half the DMA bytes.
    a1 = jnp.tanh(jnp.dot(x_ref[...], w1_ref[...],
                          preferred_element_type=jnp.float32))     # (B, DH)

    # BatchNorm1d(Dout*H): train-mode batch stats, single sum / sum-of-squares
    # pass (biased variance, eps=1e-5, affine).  Safe while a1 is tanh-bounded;
    # switch to centered / Welford stats if activations stop being bounded
    # (E[x^2]-E[x]^2 is cancellation-prone).
    # TODO(synk): running_mean / running_var buffer updates are not modeled.
    inv_n = 1.0 / a1.shape[0]
    s = jnp.sum(a1, axis=0, keepdims=True)
    ssq = jnp.sum(a1 * a1, axis=0, keepdims=True)
    mean = s * inv_n
    var = ssq * inv_n - mean * mean
    scale = jax.lax.rsqrt(var + EPS) * gamma_ref[...]               # (1, DH)
    shift = beta_ref[...] - mean * scale                            # (1, DH)
    hidden = a1 * scale + shift                                     # (B, DH)

    # Single full-block store (no packed slab, no zero-fill, no partial stores).
    hidden_ref[...] = hidden

    # dropout2 (p = 0) identity.
    # linear2: block-diagonal, so each output term o only sees its own H hidden
    # units -> elementwise mul with the flat block-diagonal weights followed by
    # a per-term H-lane reduction (VPU + XLU), not a dense (Dout*H, Dout) matmul.
    tmp = hidden * w2d_ref[...]                                     # (B, DH)
    parts = [jnp.sum(tmp[:, o * h:(o + 1) * h], axis=1, keepdims=True)
             for o in range(d_out)]                                 # Dout x (B, 1)
    y_ref[...] = jnp.tanh(jnp.concatenate(parts, axis=1))           # (B, Dout)


# --------------------------------- wrapper -----------------------------------

def graph_layer(x, w1, w2_bd, gamma, beta, hidden_size):
    """Returns (y, hidden) exactly like GraphLayer.forward.

    w2_bd is the block-diagonal SparseLinear #2 weight in (Dout, H) form.
    """
    b = x.shape[0]
    dh = w1.shape[1]
    d_out = dh // hidden_size
    w2d = w2_bd.reshape(1, dh)           # flat block-diagonal weights (wrapper side)

    hidden_flat, y = pl.pallas_call(
        graph_layer_kernel,
        out_shape=(jax.ShapeDtypeStruct((b, dh), jnp.float32),
                   jax.ShapeDtypeStruct((b, d_out), jnp.float32)),
        in_specs=[_VMEM, _VMEM, _VMEM, _VMEM, _VMEM],
        out_specs=(_VMEM, _VMEM),
    )(x, w1, w2d, gamma, beta)

    # Single cheap metadata-level reshape; doing it in-kernel would need a
    # minor-dim relayout for no gain at this size.
    hidden = hidden_flat.reshape(b, d_out, hidden_size)
    return y, hidden


# ---------------------- SparseLinear weight construction ---------------------

def make_sparse_graph_layer_weights(key, input_size, output_size, hidden_size,
                                    in_ids, out_ids):
    """Build the two SparseLinear layers with the same connectivity as the
    PyTorch module.  linear1 stays zero-masked dense (arbitrary connectivity);
    linear2 is kept in its natural block-diagonal (Dout, H) form."""
    in_ids = np.asarray(in_ids)
    out_ids = np.asarray(out_ids)

    # linear1: edge (in_ids[e] -> out_ids[e]) feeds ALL hidden units of that term.
    # TODO(synk): at real ontology sizes use block-sparse tiles driven by
    # PrefetchScalarGridSpec instead of a whole masked-dense VMEM weight.
    m1 = np.zeros((input_size, output_size * hidden_size), np.float32)
    for i, o in zip(in_ids, out_ids):
        m1[i, o * hidden_size:(o + 1) * hidden_size] = 1.0

    # linear2: hidden unit (o, h) feeds only output o (for terms that appear).
    m2 = np.zeros((output_size, hidden_size), np.float32)
    for o in np.unique(out_ids):
        m2[o, :] = 1.0

    k1, k2 = jax.random.split(key)
    w1 = jax.random.normal(k1, m1.shape, jnp.float32) * 0.2 * jnp.asarray(m1)
    w2_bd = jax.random.normal(k2, m2.shape, jnp.float32) * 0.2 * jnp.asarray(m2)
    return w1, w2_bd


# ------------------------------ pure-JAX reference ---------------------------

def graph_layer_ref(x, w1, w2_bd, gamma, beta, hidden_size):
    a1 = jnp.tanh(x @ w1)
    mean = jnp.mean(a1, axis=0, keepdims=True)
    var = jnp.mean((a1 - mean) ** 2, axis=0, keepdims=True)
    hidden = (a1 - mean) / jnp.sqrt(var + EPS) * gamma + beta
    b = x.shape[0]
    hidden3 = hidden.reshape(b, -1, hidden_size)
    y = jnp.tanh(jnp.einsum('boh,oh->bo', hidden3, w2_bd))
    return y, hidden3


# ----------------------------------- main ------------------------------------

if __name__ == "__main__":
    key = jax.random.PRNGKey(0)
    kx, kw = jax.random.split(key)

    B, D_IN, D_OUT, HIDDEN = 4, 16, 6, 8

    # Small deterministic ontology-style connectivity (every term used).
    in_ids = np.array([0, 1, 2, 3, 4, 5, 6, 7, 8, 9, 10, 11, 12, 13, 14, 15,
                       0, 5, 10, 15], np.int32)
    out_ids = np.array([0, 0, 0, 1, 1, 1, 2, 2, 2, 3, 3, 3, 4, 4, 5, 5,
                        5, 4, 2, 1], np.int32)

    w1, w2_bd = make_sparse_graph_layer_weights(kw, D_IN, D_OUT, HIDDEN,
                                                in_ids, out_ids)
    gamma = jnp.ones((1, D_OUT * HIDDEN), jnp.float32)   # BatchNorm default init
    beta = jnp.zeros((1, D_OUT * HIDDEN), jnp.float32)

    x = jax.random.normal(kx, (B, D_IN), jnp.float32)

    y, hidden = graph_layer(x, w1, w2_bd, gamma, beta, HIDDEN)
    jax.block_until_ready((y, hidden))

    # Correctness check against a plain-JAX reference of the torch forward.
    y_ref, hidden_ref = graph_layer_ref(x, w1, w2_bd, gamma, beta, HIDDEN)
    assert y.shape == (B, D_OUT)
    assert hidden.shape == (B, D_OUT, HIDDEN)
    np.testing.assert_allclose(np.asarray(y), np.asarray(y_ref),
                               rtol=2e-5, atol=2e-5)
    np.testing.assert_allclose(np.asarray(hidden), np.asarray(hidden_ref),
                               rtol=2e-5, atol=2e-5)
    assert bool(jnp.all(jnp.isfinite(y)))
    print("KERNEL_OK")
</pallas_src>

<mosaic_0001>
module attributes {stable_mosaic.version = 11 : i64} {
  func.func @graph_layer_kernel(%arg0: memref<4x16xf32, #tpu.memory_space<vmem>>, %arg1: memref<16x48xf32, #tpu.memory_space<vmem>>, %arg2: memref<1x48xf32, #tpu.memory_space<vmem>>, %arg3: memref<1x48xf32, #tpu.memory_space<vmem>>, %arg4: memref<1x48xf32, #tpu.memory_space<vmem>>, %arg5: memref<4x48xf32, #tpu.memory_space<vmem>>, %arg6: memref<4x6xf32, #tpu.memory_space<vmem>>) attributes {dimension_semantics = [], scalar_prefetch = 0 : i64, scratch_operands = 0 : i64, tpu.core_type = #tpu.core_type<tc>} {
    %c0 = arith.constant 0 : index
    %c0_0 = arith.constant 0 : index
    %0 = vector.load %arg0[%c0, %c0_0] : memref<4x16xf32, #tpu.memory_space<vmem>>, vector<4x16xf32>
    %c0_1 = arith.constant 0 : index
    %c0_2 = arith.constant 0 : index
    %1 = vector.load %arg1[%c0_1, %c0_2] : memref<16x48xf32, #tpu.memory_space<vmem>>, vector<16x48xf32>
    %cst = arith.constant dense<0.000000e+00> : vector<4x48xf32>
    %2 = tpu.matmul %0, %1, %cst {dimension_numbers = #tpu.dot_dimension_numbers<[1], [0], [0], [1], [0, 0, 1, 1], [], []>} : vector<4x16xf32>, vector<16x48xf32>, vector<4x48xf32> -> vector<4x48xf32>
    %3 = math.tanh %2 : vector<4x48xf32>
    %cst_3 = arith.constant dense<0.000000e+00> : vector<48xf32>
    %4 = vector.multi_reduction <add>, %3, %cst_3 [0] : vector<4x48xf32> to vector<48xf32>
    %5 = vector.shape_cast %4 : vector<48xf32> to vector<1x48xf32>
    %6 = arith.mulf %3, %3 : vector<4x48xf32>
    %cst_4 = arith.constant dense<0.000000e+00> : vector<48xf32>
    %7 = vector.multi_reduction <add>, %6, %cst_4 [0] : vector<4x48xf32> to vector<48xf32>
    %8 = vector.shape_cast %7 : vector<48xf32> to vector<1x48xf32>
    %cst_5 = arith.constant 2.500000e-01 : f32
    %9 = vector.broadcast %cst_5 : f32 to vector<1x48xf32>
    %10 = arith.mulf %5, %9 : vector<1x48xf32>
    %cst_6 = arith.constant 2.500000e-01 : f32
    %11 = vector.broadcast %cst_6 : f32 to vector<1x48xf32>
    %12 = arith.mulf %8, %11 : vector<1x48xf32>
    %13 = arith.mulf %10, %10 : vector<1x48xf32>
    %14 = arith.subf %12, %13 : vector<1x48xf32>
    %cst_7 = arith.constant 9.99999974E-6 : f32
    %15 = vector.broadcast %cst_7 : f32 to vector<1x48xf32>
    %16 = arith.addf %14, %15 : vector<1x48xf32>
    %17 = math.rsqrt %16 : vector<1x48xf32>
    %c0_8 = arith.constant 0 : index
    %c0_9 = arith.constant 0 : index
    %18 = vector.load %arg3[%c0_8, %c0_9] : memref<1x48xf32, #tpu.memory_space<vmem>>, vector<1x48xf32>
    %19 = arith.mulf %17, %18 : vector<1x48xf32>
    %c0_10 = arith.constant 0 : index
    %c0_11 = arith.constant 0 : index
    %20 = vector.load %arg4[%c0_10, %c0_11] : memref<1x48xf32, #tpu.memory_space<vmem>>, vector<1x48xf32>
    %21 = arith.mulf %10, %19 : vector<1x48xf32>
    %22 = arith.subf %20, %21 : vector<1x48xf32>
    %23 = vector.broadcast %19 : vector<1x48xf32> to vector<4x48xf32>
    %24 = arith.mulf %3, %23 : vector<4x48xf32>
    %25 = vector.broadcast %22 : vector<1x48xf32> to vector<4x48xf32>
    %26 = arith.addf %24, %25 : vector<4x48xf32>
    %c0_12 = arith.constant 0 : index
    %c0_13 = arith.constant 0 : index
    %27 = vector.load %arg5[%c0_12, %c0_13] : memref<4x48xf32, #tpu.memory_space<vmem>>, vector<4x48xf32>
    tpu.vector_store %arg5[%c0_12, %c0_13], %26 {strides = array<i32>} : memref<4x48xf32, #tpu.memory_space<vmem>>, vector<4x48xf32>,
    %c0_14 = arith.constant 0 : index
    %c0_15 = arith.constant 0 : index
    %28 = vector.load %arg2[%c0_14, %c0_15] : memref<1x48xf32, #tpu.memory_space<vmem>>, vector<1x48xf32>
    %29 = vector.broadcast %28 : vector<1x48xf32> to vector<4x48xf32>
    %30 = arith.mulf %26, %29 : vector<4x48xf32>
    %31 = vector.extract_strided_slice %30 {offsets = [0, 0], sizes = [4, 8], strides = [1, 1]} : vector<4x48xf32> to vector<4x8xf32>
    %cst_16 = arith.constant dense<0.000000e+00> : vector<4xf32>
    %32 = vector.multi_reduction <add>, %31, %cst_16 [1] : vector<4x8xf32> to vector<4xf32>
    %33 = vector.shape_cast %32 : vector<4xf32> to vector<4x1xf32>
    %34 = vector.extract_strided_slice %30 {offsets = [0, 8], sizes = [4, 8], strides = [1, 1]} : vector<4x48xf32> to vector<4x8xf32>
    %cst_17 = arith.constant dense<0.000000e+00> : vector<4xf32>
    %35 = vector.multi_reduction <add>, %34, %cst_17 [1] : vector<4x8xf32> to vector<4xf32>
    %36 = vector.shape_cast %35 : vector<4xf32> to vector<4x1xf32>
    %37 = vector.extract_strided_slice %30 {offsets = [0, 16], sizes = [4, 8], strides = [1, 1]} : vector<4x48xf32> to vector<4x8xf32>
    %cst_18 = arith.constant dense<0.000000e+00> : vector<4xf32>
    %38 = vector.multi_reduction <add>, %37, %cst_18 [1] : vector<4x8xf32> to vector<4xf32>
    %39 = vector.shape_cast %38 : vector<4xf32> to vector<4x1xf32>
    %40 = vector.extract_strided_slice %30 {offsets = [0, 24], sizes = [4, 8], strides = [1, 1]} : vector<4x48xf32> to vector<4x8xf32>
    %cst_19 = arith.constant dense<0.000000e+00> : vector<4xf32>
    %41 = vector.multi_reduction <add>, %40, %cst_19 [1] : vector<4x8xf32> to vector<4xf32>
    %42 = vector.shape_cast %41 : vector<4xf32> to vector<4x1xf32>
    %43 = vector.extract_strided_slice %30 {offsets = [0, 32], sizes = [4, 8], strides = [1, 1]} : vector<4x48xf32> to vector<4x8xf32>
    %cst_20 = arith.constant dense<0.000000e+00> : vector<4xf32>
    %44 = vector.multi_reduction <add>, %43, %cst_20 [1] : vector<4x8xf32> to vector<4xf32>
    %45 = vector.shape_cast %44 : vector<4xf32> to vector<4x1xf32>
    %46 = vector.extract_strided_slice %30 {offsets = [0, 40], sizes = [4, 8], strides = [1, 1]} : vector<4x48xf32> to vector<4x8xf32>
    %cst_21 = arith.constant dense<0.000000e+00> : vector<4xf32>
    %47 = vector.multi_reduction <add>, %46, %cst_21 [1] : vector<4x8xf32> to vector<4xf32>
    %48 = vector.shape_cast %47 : vector<4xf32> to vector<4x1xf32>
    %49 = tpu.concatenate %33, %36, %39, %42, %45, %48 in 1 : vector<4x1xf32>, vector<4x1xf32>, vector<4x1xf32>, vector<4x1xf32>, vector<4x1xf32>, vector<4x1xf32> -> vector<4x6xf32>
    %50 = math.tanh %49 : vector<4x6xf32>
    %c0_22 = arith.constant 0 : index
    %c0_23 = arith.constant 0 : index
    %51 = vector.load %arg6[%c0_22, %c0_23] : memref<4x6xf32, #tpu.memory_space<vmem>>, vector<4x6xf32>
    tpu.vector_store %arg6[%c0_22, %c0_23], %50 {strides = array<i32>} : memref<4x6xf32, #tpu.memory_space<vmem>>, vector<4x6xf32>,
    return
  }
}

</mosaic_0001>

<bundles_post_ra>
// kernel: tpu_custom_call.1
= control target key start
LH: loop header
LB: loop body
LE: loop exit
PB: predicated region body
PF: predicated region fallthrough
CT: control target
= control target key end

     0   :  { %12 = vsyncpa [#allocation3], 0  ;;  %s411_s0 = inlined_call_operand.hbm [shape: f32[4,16], index: 0, kind: input, shape index: {}]   ;;  %s412_s1 = inlined_call_operand.hbm [shape: f32[16,48], index: 1, kind: input, shape index: {}]   ;;  %s413_s2 = inlined_call_operand.vmem [shape: f32[1,48], index: 2, kind: input, shape index: {}]   ;;  %s414_s3 = inlined_call_operand.vmem [shape: f32[1,48], index: 3, kind: input, shape index: {}]   ;;  %s415_s4 = inlined_call_operand.vmem [shape: f32[1,48], index: 4, kind: input, shape index: {}]   ;;  %s416_s5 = inlined_call_operand.hbm [shape: f32[4,48], index: 5, kind: output, shape index: {0}]   ;;  %s417_s6 = inlined_call_operand.hbm [shape: f32[4,6], index: 6, kind: output, shape index: {1}]  }
   0x1   :  { %13 = vsyncpa [#allocation6], 0 }
   0x2   :  { %14 = vsyncpa [#allocation4], 0 }
   0x3   :  { %15 = vsyncpa [#allocation9], 0  ;;  %s21_s23 = sshll.u32 %s411_s0, 4  ;;  %s335_s24 = smov [#allocation2]   ;;  %s22_s23 = int_to_ptr.hbm [resolvable:$true] %s21_s23 }
   0x4   :  { %s23_s25 = sshll.u32 %s335_s24, 4  ;;  %s31_s28 = sshll.u32 %s412_s1, 4  ;;  %s24_s25 = int_to_ptr.vmem [resolvable:$true] %s23_s25  ;;  %s32_s28 = int_to_ptr.hbm [resolvable:$true] %s31_s28 }
   0x5   :  { %26 = dma.hbm_to_vmem [thread:$0]  %s22_s23, 64, %s24_s25, [#allocation3]  }
   0x6   :  { %s336_s29 = smov [#allocation5]   ;;  %s337_s7 = smov 128  }
   0x7   :  { %s33_s30 = sshll.u32 %s336_s29, 4  ;;  %s338_s8 = smov 8   ;;  %s34_s30 = int_to_ptr.vmem [resolvable:$true] %s33_s30 }
   0x8   :  { %39 = dma.hbm_to_vmem [thread:$0]  %s32_s28, 256, %s34_s30, [#allocation6], %s337_s7, %s337_s7, %s338_s8  }
   0x9   :  { %327 = dma.done.wait [#allocation3], 64  }
   0xa   :  { %328 = vsyncadd [#allocation3], 4294967232 }
   0xb   :  { %329 = dma.done.wait [#allocation6], 256  }
   0xc   :  { %330 = vsyncadd [#allocation6], 4294967040  ;;  %v56_v0 = vld [vmem:[#allocation5 + $0x8] sm:$0xff]  ;;  %v55_v1 = vld [vmem:[#allocation5] sm:$0xff]  ;;  %vm57_vm0 = vcmask 130048   ;;  %vm82_vm1 = vcmask 388096  }
   0xd   :  { %75 = vmatpush.msra.mxu0 %v56_v0  ;;  %v54_v2 = vld [vmem:[#allocation2] sm:$0xf]  ;;  %s340_s13 = smov 112   ;;  %s341_s14 = smov 120   ;;  %vm130_vm5 = vcmask 60416   ;;  %vm165_vm6 = vcmask 7168  }
   0xe   :  { %v113_v31 = vld [vmem:[%s414_s3] sm:$0x1]  ;;  %s339_s3 = smov 104   ;;  %s343_s15 = smov 88   ;;  %vm167_vm7 = vcmask 15360   ;;  %vm169_vm8 = vcmask 23552  }
   0xf   :  { %76 = vmatpush.msra.mxu0 %v55_v1  ;;  %v115_v34 = vld [vmem:[%s415_s4] sm:$0x1]  ;;  %s342_s4 = smov 96   ;;  %s185_s17 = sshll.u32 %s416_s5, 4  ;;  %vm171_vm9 = vcmask 31744   ;;  %vm173_vm10 = vcmask 39936   ;;  %s186_s17 = int_to_ptr.hbm [resolvable:$true] %s185_s17 }
  0x10   :  { %212 = vmatmul.msk.f32.vlgmr.msra.gmra.mxu0 %vm57_vm0, %v54_v2  ;;  %v224_v40 = vld [vmem:[%s413_s2] ss:$0 sm:$0xff]  ;;  %s344_s18 = smov [#allocation7]   ;;  %s345_s5 = smov [#allocation8]   ;;  %vm176_vm11 = vcmask 44032  }
  0x11   :  { %s183_s19 = sshll.u32 %s344_s18, 4  ;;  %s194_s20 = sshll.u32 %s345_s5, 4  ;;  %s184_s19 = int_to_ptr.vmem [resolvable:$true] %s183_s19  ;;  %s195_s20 = int_to_ptr.vmem [resolvable:$true] %s194_s20 }
  0x12   :  { %s196_s23 = sshll.u32 %s417_s6, 4  ;;  %s197_s23 = int_to_ptr.hbm [resolvable:$true] %s196_s23 }
  0x8d   :  { %v78_v3 = vpop.f32.mrf.mxu0 }
  0x8e   :  { %225 = vtanh.f32 %v78_v3 }
  0x94   :  { %v226_v4 = vpop.eup %225 }
  0x95   :  { %v83_v5 = vsel %vm82_vm1, %v226_v4, 0.0  ;;  %v90_v6 = vmul.f32 %v226_v4, %v226_v4 }
  0x96   :  { %v84_v7 = vrot.slane %v83_v5, 4 }
  0x97   :  { %v91_v8 = vsel %vm82_vm1, %v90_v6, 0.0 }
  0x98   :  { %v85_v9 = vadd.f32 %v84_v7, %v83_v5  ;;  %v92_v10 = vrot.slane %v91_v8, 4 }
  0x9a   :  { %v86_v11 = vrot.slane %v85_v9, 2  ;;  %v93_v12 = vadd.f32 %v92_v10, %v91_v8 }
  0x9c   :  { %v87_v13 = vadd.f32 %v86_v11, %v85_v9  ;;  %v94_v14 = vrot.slane %v93_v12, 2 }
  0x9e   :  { %v88_v15 = vrot.slane %v87_v13, 1  ;;  %v95_v16 = vadd.f32 %v94_v14, %v93_v12 }
  0xa0   :  { %v89_v17 = vadd.f32 %v88_v15, %v87_v13  ;;  %v96_v18 = vrot.slane %v95_v16, 1 }
  0xa2   :  { %v97_v19 = vadd.f32 %v96_v18, %v95_v16  ;;  %v98_v20 = vmul.f32 0.25, %v89_v17 }
  0xa4   :  { %v99_v21 = vmul.f32 0.25, %v97_v19  ;;  %v100_v22 = vmul.f32 %v98_v20, %v98_v20 }
  0xa6   :  { %v101_v23 = vsub.f32 %v99_v21, %v100_v22 }
  0xa8   :  { %v102_v24 = vadd.f32 1e-05, %v101_v23 }
  0xaa   :  { %227 = vrsqrt.f32 %v102_v24  ;;  %vm109_vm3 = vweird.f32 %v102_v24 }
  0xb0   :  { %v228_v25 = vpop.eup %227 }
  0xb1   :  { %v104_v26 = vmul.f32 %v228_v25, %v102_v24  ;;  %vm110_vm2 = vweird.f32 %v228_v25 }
  0xb2   :  { %vm111_vm4 = vmor %vm109_vm3, %vm110_vm2 }
  0xb3   :  { %v105_v27 = vmul.f32 %v228_v25, %v104_v26 }
  0xb5   :  { %v106_v28 = vmul.f32 0.5, %v105_v27 }
  0xb7   :  { %v107_v29 = vsub.f32 1.5, %v106_v28 }
  0xb9   :  { %v108_v30 = vmul.f32 %v228_v25, %v107_v29 }
  0xbb   :  { %v112_v32 = vsel %vm111_vm4, %v228_v25, %v108_v30 }
  0xbc   :  { %v114_v33 = vmul.f32 %v113_v31, %v112_v32 }
  0xbe   :  { %v116_v35 = vmul.f32 %v114_v33, %v98_v20  ;;  %v118_v36 = vperm.slane %v114_v33, 0 }
  0xc0   :  { %v117_v37 = vsub.f32 %v115_v34, %v116_v35  ;;  %v119_v38 = vmul.f32 %v226_v4, %v118_v36 }
  0xc2   :  { %v121_v39 = vperm.slane %v117_v37, 0 }
  0xc4   :  { %v123_v41 = vadd.f32 %v121_v39, %v119_v38 }
  0xc6   :  { %124 = vst.msk [vmem:[#allocation7] sm:$0xf] %vm82_vm1, %v123_v41  ;;  %v129_v42 = vmul.f32 %v224_v40, %v123_v41 }
  0xc7   :  { %188 = dma.vmem_to_hbm [thread:$0]  %s184_s19, 64, %s186_s17, [#allocation4]  }
  0xc8   :  { %147 = vrot.lane.b32.xlu2 %v129_v42, %s339_s3  ;;  %141 = vrot.lane.b32.xlu1 %v129_v42, %s340_s13  ;;  %v131_v43 = vsel %vm130_vm5, %v129_v42, 0.0 }
  0xc9   :  { %135 = vrot.lane.b32.xlu0 %v129_v42, %s341_s14 }
  0xd0   :  { %153 = vrot.lane.b32.xlu2 %v129_v42, %s342_s4 }
  0xd8   :  { %159 = vrot.lane.b32.xlu2 %v129_v42, %s343_s15 }
  0xf3   :  { %132 = vadd.xlane.f32.xlu0 %v131_v43 }
 0x122   :  { %v148_v44 = vpop.permute.xlu2 %147 }
 0x123   :  { %v150_v45 = vsel %vm130_vm5, %v148_v44, 0.0 }
 0x124   :  { %151 = vadd.xlane.f32.xlu0 %v150_v45 }
 0x12a   :  { %v154_v46 = vpop.permute.xlu2 %153 }
 0x12b   :  { %v156_v53 = vsel %vm130_vm5, %v154_v46, 0.0 }
 0x132   :  { %v160_v51 = vpop.permute.xlu2 %159 }
 0x133   :  { %v162_v52 = vsel %vm130_vm5, %v160_v51, 0.0 }
 0x13a   :  { %v142_v47 = vpop.permute.xlu1 %141 }
 0x13b   :  { %v136_v48 = vpop.permute.xlu0 %135  ;;  %v144_v49 = vsel %vm130_vm5, %v142_v47, 0.0 }
 0x13c   :  { %145 = vadd.xlane.f32.xlu2 %v144_v49  ;;  %v138_v50 = vsel %vm130_vm5, %v136_v48, 0.0 }
 0x13d   :  { %139 = vadd.xlane.f32.xlu1 %v138_v50 }
 0x144   :  { %163 = vadd.xlane.f32.xlu2 %v162_v52 }
 0x145   :  { %157 = vadd.xlane.f32.xlu1 %v156_v53 }
 0x166   :  { %v133_v54 = vpop.xlane.xlu0 %132 }
 0x197   :  { %v152_v59 = vpop.xlane.xlu0 %151 }
 0x1af   :  { %v146_v55 = vpop.xlane.xlu2 %145 }
 0x1b0   :  { %v140_v56 = vpop.xlane.xlu1 %139 }
 0x1b1   :  { %v166_v57 = vsel %vm165_vm6, %v133_v54, %v140_v56 }
 0x1b2   :  { %v168_v58 = vsel %vm167_vm7, %v166_v57, %v146_v55 }
 0x1b3   :  { %v170_v62 = vsel %vm169_vm8, %v168_v58, %v152_v59 }
 0x1b7   :  { %v164_v60 = vpop.xlane.xlu2 %163 }
 0x1b8   :  { %v158_v61 = vpop.xlane.xlu1 %157 }
 0x1b9   :  { %v172_v63 = vsel %vm171_vm9, %v170_v62, %v158_v61 }
 0x1ba   :  { %v174_v0 = vsel %vm173_vm10, %v172_v63, %v164_v60 }
 0x1bb   :  { %229 = vtanh.f32 %v174_v0 }
 0x1c1   :  { %v230_v1 = vpop.eup %229 }
 0x1c2   :  { %177 = vst.msk [vmem:[#allocation8] sm:$0xf] %vm176_vm11, %v230_v1 }
 0x1c3   :  { %199 = dma.vmem_to_hbm [thread:$0]  %s195_s20, 64, %s197_s23, [#allocation9]  }
 0x1c4   :  { %331 = dma.done.wait [#allocation4], 64  }
 0x1c5   :  { %332 = vsyncadd [#allocation4], 4294967232 }
 0x1c6   :  { %333 = dma.done.wait [#allocation9], 64  }
 0x1c7   :  { %334 = vsyncadd [#allocation9], 4294967232 }
 0x1c8   :  { %208 = vsyncpa [#allocation3], 1 }
 0x1c9   :  { %209 = vsyncpa [#allocation6], 1 }
 0x1ca   :  { %210 = vsyncpa [#allocation4], 1 }
 0x1cb   :  { %211 = vsyncpa [#allocation9], 1 }

</bundles_post_ra>
